<compile_context>
chip_gen: v6e
topology: v6e:2x2x1
jax: 0.10.0
libtpu: 0.0.40
codegen_flags: <defaults>
</compile_context>

<pallas_src>
import functools
import math

import jax
import jax.numpy as jnp
from jax import lax
from jax.experimental import pallas as pl
from jax.experimental.pallas import tpu as pltpu


def _round_up(x, m):
    return ((x + m - 1) // m) * m


# ----------------------------------------------------------------------------
# Pallas kernel: one (batch, HW-tile) slab per grid step.
#   conv_first (split feat/mask 1x1, BN1 folded) -> ReLU
#   causal dilated depthwise conv along H (BN2 folded) -> ReLU
#   conv_second (1x1) + residual(feature)
# ----------------------------------------------------------------------------
def tcm_kernel(feat_ref, mask_ref, w1f_ref, w1m_ref, b1_ref, dw_ref, b2_ref,
               w2_ref, out_ref, xcf_ref, halo_ref,
               *, K, rate, W, TH, halo, halo_pad, num_tiles):
    t = pl.program_id(1)

    if K > 1:
        # Causal zero "pad" at the start of every batch element's sequence.
        @pl.when(t == 0)
        def _init_halo():
            halo_ref[...] = jnp.zeros(halo_ref.shape, jnp.float32)

    feat = feat_ref[0]                                     # (TH, C) input dtype
    msk = mask_ref[0]                                      # (TH, C)

    # conv_first: fused-channel 1x1 conv as two matmuls (feature + mask),
    # BN1 scale folded into weight columns; only folded bias + ReLU remain.
    x1 = (jnp.dot(feat, w1f_ref[...], preferred_element_type=jnp.float32)
          + jnp.dot(msk, w1m_ref[...], preferred_element_type=jnp.float32))
    x1 = jnp.maximum(x1 + b1_ref[...], 0.0)                # (TH, mid) f32
    xcf_ref[0] = x1.astype(xcf_ref.dtype)                  # second module output

    # Causal dilated depthwise conv along H (flattened: d rows in H = d*W rows).
    # Taps are static slices of [prev-tile halo rows | register-resident x1].
    dw = dw_ref[...]                                       # (K, mid) f32, BN2-folded
    acc = x1 * dw[K - 1:K, :]                              # tap K-1: zero shift
    if K > 1:
        ext = jnp.concatenate([halo_ref[...], x1], axis=0)  # (halo_pad+TH, mid)
        for k in range(K - 1):                               # static, small unroll
            s = (K - 1 - k) * rate * W                       # s <= halo <= TH
            acc = acc + ext[halo_pad - s:halo_pad - s + TH, :] * dw[k:k + 1, :]
        if num_tiles > 1:
            # Carry the last `halo` rows of x1 (from registers) to the next tile.
            halo_ref[pl.ds(halo_pad - halo, halo), :] = x1[TH - halo:, :]
    x2 = jnp.maximum(acc + b2_ref[...], 0.0)               # (TH, mid) f32

    # conv_second + residual (feature is a separate unpadded input -> no mask).
    out = jnp.dot(x2.astype(w2_ref.dtype), w2_ref[...],
                  preferred_element_type=jnp.float32)
    out_ref[0] = (out + feat.astype(jnp.float32)).astype(out_ref.dtype)


# ----------------------------------------------------------------------------
# VMEM-budget-aware HW-tile selection (fits v7x's 32 MiB scoped default).
# ----------------------------------------------------------------------------
def _select_tile_hw(HW, C, mid, K, halo, halo_pad, itemsize, budget=20 << 20):
    def vmem_need(th):
        io = 2 * 2 * th * C * itemsize                   # feat + mask, 2 buffers
        io += 2 * th * (C + mid) * itemsize              # out + xcf,   2 buffers
        live = 4 * (halo_pad + th) * mid * 4             # x1/ext/acc/x2 f32 temps
        wts = (2 * C * mid + (K + 2) * mid + mid * C) * 4 * 2
        return io + live + wts + halo_pad * mid * 4
    for cand in (8192, 4096, 2048, 1024, 512, 256, 128, 64, 32, 16, 8):
        if cand < HW and HW % cand == 0 and cand >= halo and vmem_need(cand) <= budget:
            return cand
    return HW      # single-tile fallback (whole flattened sequence)


# ----------------------------------------------------------------------------
# Wrapper: channels-last layout, BN folding, pallas_call setup.
# ----------------------------------------------------------------------------
def tcm_forward(feature, mask, params, *, depth_ker_size, rate, eps=1e-3,
                tile_hw=None):
    B, C, H, W = feature.shape
    K = depth_ker_size
    mid = params["w1"].shape[0]
    HW = H * W
    halo = (K - 1) * rate * W
    halo_pad = _round_up(max(halo, 8), 8)          # sublane-aligned scratch rows
    dtype = feature.dtype
    itemsize = jnp.dtype(dtype).itemsize

    if tile_hw is None:
        tile_hw = _select_tile_hw(HW, C, mid, K, halo, halo_pad, itemsize)
    assert HW % tile_hw == 0, "tile_hw must divide H*W"
    num_tiles = HW // tile_hw
    if num_tiles > 1:
        assert tile_hw % 8 == 0 and tile_hw >= halo, \
            "tiled HW requires tile_hw % 8 == 0 and tile_hw >= (K-1)*rate*W"

    # Channels-last, UNPADDED inputs (HBM-bound kernel: do not inflate bytes).
    # TODO(synk): if stacked, keep (B, HW, C) between layers and drop these
    #             per-layer NCHW<->NHWC transposes.
    f_nlc = jnp.transpose(feature, (0, 2, 3, 1)).reshape(B, HW, C)
    m_nlc = jnp.transpose(mask, (0, 2, 3, 1)).reshape(B, HW, C)

    # Inference-mode BatchNorm folding (module uses eps=0.001).
    s1 = params["bn1_gamma"] / jnp.sqrt(params["bn1_var"] + eps)
    b1 = params["bn1_beta"] - params["bn1_mean"] * s1
    s2 = params["bn2_gamma"] / jnp.sqrt(params["bn2_var"] + eps)
    b2 = params["bn2_beta"] - params["bn2_mean"] * s2

    w1 = params["w1"]                                            # (mid, 2C)
    w1f = (jnp.transpose(w1[:, :C]) * s1[None, :]).astype(dtype)  # (C, mid)
    w1m = (jnp.transpose(w1[:, C:]) * s1[None, :]).astype(dtype)  # (C, mid)
    b1r = b1.reshape(1, mid).astype(jnp.float32)
    dwf = (params["dw"] * s2[None, :]).astype(jnp.float32)        # (K, mid)
    b2r = b2.reshape(1, mid).astype(jnp.float32)
    w2t = jnp.transpose(params["w2"]).astype(dtype)               # (mid, C)

    kernel = functools.partial(
        tcm_kernel, K=K, rate=rate, W=W, TH=tile_hw,
        halo=halo, halo_pad=halo_pad, num_tiles=num_tiles)

    out_nlc, xcf_nlc = pl.pallas_call(
        kernel,
        out_shape=(jax.ShapeDtypeStruct((B, HW, C), dtype),
                   jax.ShapeDtypeStruct((B, HW, mid), dtype)),
        grid_spec=pltpu.PrefetchScalarGridSpec(
            num_scalar_prefetch=0,
            grid=(B, num_tiles),
            in_specs=[
                pl.BlockSpec((1, tile_hw, C), lambda b, t: (b, t, 0)),   # feature
                pl.BlockSpec((1, tile_hw, C), lambda b, t: (b, t, 0)),   # mask
                pl.BlockSpec((C, mid), lambda b, t: (0, 0)),             # w1 (feature half, BN1 folded)
                pl.BlockSpec((C, mid), lambda b, t: (0, 0)),             # w1 (mask half, BN1 folded)
                pl.BlockSpec((1, mid), lambda b, t: (0, 0)),             # bn1 folded bias
                pl.BlockSpec((K, mid), lambda b, t: (0, 0)),             # depthwise taps (BN2 folded)
                pl.BlockSpec((1, mid), lambda b, t: (0, 0)),             # bn2 folded bias
                pl.BlockSpec((mid, C), lambda b, t: (0, 0)),             # w2
            ],
            out_specs=[
                pl.BlockSpec((1, tile_hw, C), lambda b, t: (b, t, 0)),   # main output
                pl.BlockSpec((1, tile_hw, mid), lambda b, t: (b, t, 0)), # x_conv_first
            ],
            scratch_shapes=[
                pltpu.VMEM((halo_pad, mid), jnp.float32),                # halo carry only
            ]),
        compiler_params=pltpu.CompilerParams(
            dimension_semantics=("parallel", "arbitrary"),
            vmem_limit_bytes=32 * 1024 * 1024),
    )(f_nlc, m_nlc, w1f, w1m, b1r, dwf, b2r, w2t)

    # Back to NCHW to match the PyTorch return convention.
    out_nchw = out_nlc.reshape(B, H, W, C).transpose(0, 3, 1, 2)
    xcf_nchw = xcf_nlc.reshape(B, H, W, mid).transpose(0, 3, 1, 2)
    return out_nchw, xcf_nchw


# ----------------------------------------------------------------------------
# Pure-JAX reference (independent path; HIGHEST precision so it is f32-exact).
# ----------------------------------------------------------------------------
def tcm_reference(feature, mask, params, *, depth_ker_size, rate, eps=1e-3):
    K = depth_ker_size
    mid = params["w1"].shape[0]
    hp = lax.Precision.HIGHEST

    concat = jnp.concatenate([feature, mask], axis=1)              # (B, 2C, H, W)
    x1 = jnp.einsum("bchw,oc->bohw", concat, params["w1"], precision=hp)

    s1 = params["bn1_gamma"] / jnp.sqrt(params["bn1_var"] + eps)
    b1 = params["bn1_beta"] - params["bn1_mean"] * s1
    x1 = jnp.maximum(x1 * s1[None, :, None, None] + b1[None, :, None, None], 0.0)

    pad = (K - 1) * rate
    xp = jnp.pad(x1, ((0, 0), (0, 0), (pad, 0), (0, 0)))
    dw_rhs = jnp.transpose(params["dw"]).reshape(mid, 1, K, 1)     # (O, I/g, kH, kW)
    xdw = lax.conv_general_dilated(
        xp, dw_rhs, window_strides=(1, 1), padding="VALID",
        rhs_dilation=(rate, 1),
        dimension_numbers=("NCHW", "OIHW", "NCHW"),
        feature_group_count=mid, precision=hp)

    s2 = params["bn2_gamma"] / jnp.sqrt(params["bn2_var"] + eps)
    b2 = params["bn2_beta"] - params["bn2_mean"] * s2
    xdw = jnp.maximum(xdw * s2[None, :, None, None] + b2[None, :, None, None], 0.0)

    out = jnp.einsum("bchw,oc->bohw", xdw, params["w2"], precision=hp) + feature
    return out, x1


# ----------------------------------------------------------------------------
# Deterministic parameter construction (xavier_normal_-like init, fixed BN stats).
# ----------------------------------------------------------------------------
def make_params(key, in_channels, mid_channels, depth_ker_size):
    def xavier_normal(k, shape, fan_in, fan_out):
        std = math.sqrt(2.0 / (fan_in + fan_out))
        return std * jax.random.normal(k, shape, jnp.float32)

    ks = jax.random.split(key, 9)
    C, M, K = in_channels, mid_channels, depth_ker_size
    return {
        # conv_first.weight (M, 2C, 1, 1)  -> stored (M, 2C)
        "w1": xavier_normal(ks[0], (M, 2 * C), fan_in=2 * C, fan_out=M),
        # conv_depthwise.weight (M, 1, K, 1) -> stored (K, M)
        "dw": xavier_normal(ks[1], (K, M), fan_in=K, fan_out=M * K),
        # conv_second.weight (C, M, 1, 1) -> stored (C, M)
        "w2": xavier_normal(ks[2], (C, M), fan_in=M, fan_out=C),
        # BatchNorm (deterministic, non-trivial inference-mode stats)
        "bn1_gamma": 1.0 + 0.1 * jax.random.normal(ks[3], (M,), jnp.float32),
        "bn1_beta": 0.1 * jax.random.normal(ks[4], (M,), jnp.float32),
        "bn1_mean": 0.1 * jax.random.normal(ks[5], (M,), jnp.float32),
        "bn1_var": jax.random.uniform(ks[6], (M,), jnp.float32, 0.5, 1.5),
        "bn2_gamma": 1.0 + 0.1 * jax.random.normal(ks[7], (M,), jnp.float32),
        "bn2_beta": 0.1 * jax.random.normal(ks[8], (M,), jnp.float32),
        "bn2_mean": jnp.zeros((M,), jnp.float32),
        "bn2_var": jnp.ones((M,), jnp.float32),
    }


if __name__ == "__main__":
    # Small shapes consistent with the module: NCHW, H = time (causal) axis.
    B, C_in, mid, H, W = 2, 4, 8, 16, 8
    depth_ker_size, rate = 3, 2

    key = jax.random.PRNGKey(0)
    k_f, k_m, k_p = jax.random.split(key, 3)
    feature = jax.random.normal(k_f, (B, C_in, H, W), jnp.float32)
    mask = jax.random.normal(k_m, (B, C_in, H, W), jnp.float32)
    params = make_params(k_p, C_in, mid, depth_ker_size)

    # tile_hw=64 -> 2 HW tiles per batch element, exercising the causal
    # halo-carry path (halo = (K-1)*rate*W = 32 rows).
    out_main, x_conv_first = tcm_forward(
        feature, mask, params, depth_ker_size=depth_ker_size, rate=rate,
        tile_hw=64)
    jax.block_until_ready((out_main, x_conv_first))

    ref_main, ref_xcf = tcm_reference(
        feature, mask, params, depth_ker_size=depth_ker_size, rate=rate)

    assert out_main.shape == (B, C_in, H, W)
    assert x_conv_first.shape == (B, mid, H, W)
    assert jnp.allclose(out_main, ref_main, atol=2e-4, rtol=2e-4), \
        float(jnp.max(jnp.abs(out_main - ref_main)))
    assert jnp.allclose(x_conv_first, ref_xcf, atol=2e-4, rtol=2e-4), \
        float(jnp.max(jnp.abs(x_conv_first - ref_xcf)))

    print("KERNEL_OK")
</pallas_src>

<mosaic_0001>
module attributes {stable_mosaic.version = 11 : i64} {
  func.func @tcm_kernel(%arg0: i32, %arg1: i32, %arg2: memref<1x64x4xf32, #tpu.memory_space<vmem>>, %arg3: memref<1x64x4xf32, #tpu.memory_space<vmem>>, %arg4: memref<4x8xf32, #tpu.memory_space<vmem>>, %arg5: memref<4x8xf32, #tpu.memory_space<vmem>>, %arg6: memref<1x8xf32, #tpu.memory_space<vmem>>, %arg7: memref<3x8xf32, #tpu.memory_space<vmem>>, %arg8: memref<1x8xf32, #tpu.memory_space<vmem>>, %arg9: memref<8x4xf32, #tpu.memory_space<vmem>>, %arg10: memref<1x64x4xf32, #tpu.memory_space<vmem>>, %arg11: memref<1x64x8xf32, #tpu.memory_space<vmem>>, %arg12: memref<32x8xf32, #tpu.memory_space<vmem>>) attributes {dimension_semantics = [#tpu.dimension_semantics<parallel>, #tpu.dimension_semantics<arbitrary>], iteration_bounds = array<i64: 2, 2>, scalar_prefetch = 0 : i64, scratch_operands = 1 : i64, tpu.core_type = #tpu.core_type<tc>, window_params = [{transform_indices = @transform_0, window_bounds = array<i64: 1, 64, 4>}, {transform_indices = @transform_1, window_bounds = array<i64: 1, 64, 4>}, {pipeline_mode = #tpu.pipeline_mode<synchronous>, transform_indices = @transform_2, window_bounds = array<i64: 4, 8>}, {pipeline_mode = #tpu.pipeline_mode<synchronous>, transform_indices = @transform_3, window_bounds = array<i64: 4, 8>}, {pipeline_mode = #tpu.pipeline_mode<synchronous>, transform_indices = @transform_4, window_bounds = array<i64: 1, 8>}, {pipeline_mode = #tpu.pipeline_mode<synchronous>, transform_indices = @transform_5, window_bounds = array<i64: 3, 8>}, {pipeline_mode = #tpu.pipeline_mode<synchronous>, transform_indices = @transform_6, window_bounds = array<i64: 1, 8>}, {pipeline_mode = #tpu.pipeline_mode<synchronous>, transform_indices = @transform_7, window_bounds = array<i64: 8, 4>}, {transform_indices = @transform_8, window_bounds = array<i64: 1, 64, 4>}, {transform_indices = @transform_9, window_bounds = array<i64: 1, 64, 8>}]} {
    %c0_i32 = arith.constant 0 : i32
    %0 = arith.cmpi eq, %arg1, %c0_i32 : i32
    %1 = arith.extui %0 : i1 to i32
    %c0_i32_0 = arith.constant 0 : i32
    %2 = arith.cmpi ne, %1, %c0_i32_0 : i32
    scf.if %2 {
      %cst_32 = arith.constant 0.000000e+00 : f32
      %49 = vector.broadcast %cst_32 : f32 to vector<32x8xf32>
      %c0_33 = arith.constant 0 : index
      %c0_34 = arith.constant 0 : index
      %50 = vector.load %arg12[%c0_33, %c0_34] : memref<32x8xf32, #tpu.memory_space<vmem>>, vector<32x8xf32>
      tpu.vector_store %arg12[%c0_33, %c0_34], %49 {strides = array<i32>} : memref<32x8xf32, #tpu.memory_space<vmem>>, vector<32x8xf32>,
    } else {
    }
    %c0 = arith.constant 0 : index
    %c0_1 = arith.constant 0 : index
    %c0_2 = arith.constant 0 : index
    %3 = vector.load %arg2[%c0, %c0_1, %c0_2] : memref<1x64x4xf32, #tpu.memory_space<vmem>>, vector<1x64x4xf32>
    %4 = vector.shape_cast %3 : vector<1x64x4xf32> to vector<64x4xf32>
    %c0_3 = arith.constant 0 : index
    %c0_4 = arith.constant 0 : index
    %c0_5 = arith.constant 0 : index
    %5 = vector.load %arg3[%c0_3, %c0_4, %c0_5] : memref<1x64x4xf32, #tpu.memory_space<vmem>>, vector<1x64x4xf32>
    %6 = vector.shape_cast %5 : vector<1x64x4xf32> to vector<64x4xf32>
    %c0_6 = arith.constant 0 : index
    %c0_7 = arith.constant 0 : index
    %7 = vector.load %arg4[%c0_6, %c0_7] : memref<4x8xf32, #tpu.memory_space<vmem>>, vector<4x8xf32>
    %cst = arith.constant dense<0.000000e+00> : vector<64x8xf32>
    %8 = tpu.matmul %4, %7, %cst {dimension_numbers = #tpu.dot_dimension_numbers<[1], [0], [0], [1], [0, 0, 1, 1], [], []>} : vector<64x4xf32>, vector<4x8xf32>, vector<64x8xf32> -> vector<64x8xf32>
    %c0_8 = arith.constant 0 : index
    %c0_9 = arith.constant 0 : index
    %9 = vector.load %arg5[%c0_8, %c0_9] : memref<4x8xf32, #tpu.memory_space<vmem>>, vector<4x8xf32>
    %cst_10 = arith.constant dense<0.000000e+00> : vector<64x8xf32>
    %10 = tpu.matmul %6, %9, %cst_10 {dimension_numbers = #tpu.dot_dimension_numbers<[1], [0], [0], [1], [0, 0, 1, 1], [], []>} : vector<64x4xf32>, vector<4x8xf32>, vector<64x8xf32> -> vector<64x8xf32>
    %11 = arith.addf %8, %10 : vector<64x8xf32>
    %c0_11 = arith.constant 0 : index
    %c0_12 = arith.constant 0 : index
    %12 = vector.load %arg6[%c0_11, %c0_12] : memref<1x8xf32, #tpu.memory_space<vmem>>, vector<1x8xf32>
    %13 = vector.broadcast %12 : vector<1x8xf32> to vector<64x8xf32>
    %14 = arith.addf %11, %13 : vector<64x8xf32>
    %cst_13 = arith.constant 0.000000e+00 : f32
    %15 = vector.broadcast %cst_13 : f32 to vector<64x8xf32>
    %16 = arith.maximumf %14, %15 : vector<64x8xf32>
    %c0_14 = arith.constant 0 : index
    %c0_15 = arith.constant 0 : index
    %c0_16 = arith.constant 0 : index
    %17 = vector.load %arg11[%c0_14, %c0_15, %c0_16] : memref<1x64x8xf32, #tpu.memory_space<vmem>>, vector<1x64x8xf32>
    %18 = vector.shape_cast %17 : vector<1x64x8xf32> to vector<64x8xf32>
    %19 = vector.shape_cast %16 : vector<64x8xf32> to vector<1x64x8xf32>
    tpu.vector_store %arg11[%c0_14, %c0_15, %c0_16], %19 {strides = array<i32>} : memref<1x64x8xf32, #tpu.memory_space<vmem>>, vector<1x64x8xf32>,
    %c0_17 = arith.constant 0 : index
    %c0_18 = arith.constant 0 : index
    %20 = vector.load %arg7[%c0_17, %c0_18] : memref<3x8xf32, #tpu.memory_space<vmem>>, vector<3x8xf32>
    %21 = vector.extract_strided_slice %20 {offsets = [2, 0], sizes = [1, 8], strides = [1, 1]} : vector<3x8xf32> to vector<1x8xf32>
    %22 = vector.broadcast %21 : vector<1x8xf32> to vector<64x8xf32>
    %23 = arith.mulf %16, %22 : vector<64x8xf32>
    %c0_19 = arith.constant 0 : index
    %c0_20 = arith.constant 0 : index
    %24 = vector.load %arg12[%c0_19, %c0_20] : memref<32x8xf32, #tpu.memory_space<vmem>>, vector<32x8xf32>
    %25 = tpu.concatenate %24, %16 in 0 : vector<32x8xf32>, vector<64x8xf32> -> vector<96x8xf32>
    %26 = vector.extract_strided_slice %25 {offsets = [0, 0], sizes = [64, 8], strides = [1, 1]} : vector<96x8xf32> to vector<64x8xf32>
    %27 = vector.extract_strided_slice %20 {offsets = [0, 0], sizes = [1, 8], strides = [1, 1]} : vector<3x8xf32> to vector<1x8xf32>
    %28 = vector.broadcast %27 : vector<1x8xf32> to vector<64x8xf32>
    %29 = arith.mulf %26, %28 : vector<64x8xf32>
    %30 = arith.addf %23, %29 : vector<64x8xf32>
    %31 = vector.extract_strided_slice %25 {offsets = [16, 0], sizes = [64, 8], strides = [1, 1]} : vector<96x8xf32> to vector<64x8xf32>
    %32 = vector.extract_strided_slice %20 {offsets = [1, 0], sizes = [1, 8], strides = [1, 1]} : vector<3x8xf32> to vector<1x8xf32>
    %33 = vector.broadcast %32 : vector<1x8xf32> to vector<64x8xf32>
    %34 = arith.mulf %31, %33 : vector<64x8xf32>
    %35 = arith.addf %30, %34 : vector<64x8xf32>
    %36 = vector.extract_strided_slice %16 {offsets = [32, 0], sizes = [32, 8], strides = [1, 1]} : vector<64x8xf32> to vector<32x8xf32>
    %c0_21 = arith.constant 0 : index
    %c0_22 = arith.constant 0 : index
    %37 = vector.load %arg12[%c0_21, %c0_22] : memref<32x8xf32, #tpu.memory_space<vmem>>, vector<32x8xf32>
    tpu.vector_store %arg12[%c0_21, %c0_22], %36 {strides = array<i32>} : memref<32x8xf32, #tpu.memory_space<vmem>>, vector<32x8xf32>,
    %c0_23 = arith.constant 0 : index
    %c0_24 = arith.constant 0 : index
    %38 = vector.load %arg8[%c0_23, %c0_24] : memref<1x8xf32, #tpu.memory_space<vmem>>, vector<1x8xf32>
    %39 = vector.broadcast %38 : vector<1x8xf32> to vector<64x8xf32>
    %40 = arith.addf %35, %39 : vector<64x8xf32>
    %cst_25 = arith.constant 0.000000e+00 : f32
    %41 = vector.broadcast %cst_25 : f32 to vector<64x8xf32>
    %42 = arith.maximumf %40, %41 : vector<64x8xf32>
    %c0_26 = arith.constant 0 : index
    %c0_27 = arith.constant 0 : index
    %43 = vector.load %arg9[%c0_26, %c0_27] : memref<8x4xf32, #tpu.memory_space<vmem>>, vector<8x4xf32>
    %cst_28 = arith.constant dense<0.000000e+00> : vector<64x4xf32>
    %44 = tpu.matmul %42, %43, %cst_28 {dimension_numbers = #tpu.dot_dimension_numbers<[1], [0], [0], [1], [0, 0, 1, 1], [], []>} : vector<64x8xf32>, vector<8x4xf32>, vector<64x4xf32> -> vector<64x4xf32>
    %45 = arith.addf %44, %4 : vector<64x4xf32>
    %c0_29 = arith.constant 0 : index
    %c0_30 = arith.constant 0 : index
    %c0_31 = arith.constant 0 : index
    %46 = vector.load %arg10[%c0_29, %c0_30, %c0_31] : memref<1x64x4xf32, #tpu.memory_space<vmem>>, vector<1x64x4xf32>
    %47 = vector.shape_cast %46 : vector<1x64x4xf32> to vector<64x4xf32>
    %48 = vector.shape_cast %45 : vector<64x4xf32> to vector<1x64x4xf32>
    tpu.vector_store %arg10[%c0_29, %c0_30, %c0_31], %48 {strides = array<i32>} : memref<1x64x4xf32, #tpu.memory_space<vmem>>, vector<1x64x4xf32>,
    return
  }
  func.func @transform_0(%arg0: i32, %arg1: i32) -> (i32, i32, i32) {
    %c0_i32 = arith.constant 0 : i32
    %c0_i32_0 = arith.constant 0 : i32
    return %arg0, %arg1, %c0_i32 : i32, i32, i32
  }
  func.func @transform_1(%arg0: i32, %arg1: i32) -> (i32, i32, i32) {
    %c0_i32 = arith.constant 0 : i32
    %c0_i32_0 = arith.constant 0 : i32
    return %arg0, %arg1, %c0_i32 : i32, i32, i32
  }
  func.func @transform_2(%arg0: i32, %arg1: i32) -> (i32, i32) {
    %c0_i32 = arith.constant 0 : i32
    %c0_i32_0 = arith.constant 0 : i32
    %c0_i32_1 = arith.constant 0 : i32
    return %c0_i32, %c0_i32_0 : i32, i32
  }
  func.func @transform_3(%arg0: i32, %arg1: i32) -> (i32, i32) {
    %c0_i32 = arith.constant 0 : i32
    %c0_i32_0 = arith.constant 0 : i32
    %c0_i32_1 = arith.constant 0 : i32
    return %c0_i32, %c0_i32_0 : i32, i32
  }
  func.func @transform_4(%arg0: i32, %arg1: i32) -> (i32, i32) {
    %c0_i32 = arith.constant 0 : i32
    %c0_i32_0 = arith.constant 0 : i32
    %c0_i32_1 = arith.constant 0 : i32
    return %c0_i32, %c0_i32_0 : i32, i32
  }
  func.func @transform_5(%arg0: i32, %arg1: i32) -> (i32, i32) {
    %c0_i32 = arith.constant 0 : i32
    %c0_i32_0 = arith.constant 0 : i32
    %c0_i32_1 = arith.constant 0 : i32
    return %c0_i32, %c0_i32_0 : i32, i32
  }
  func.func @transform_6(%arg0: i32, %arg1: i32) -> (i32, i32) {
    %c0_i32 = arith.constant 0 : i32
    %c0_i32_0 = arith.constant 0 : i32
    %c0_i32_1 = arith.constant 0 : i32
    return %c0_i32, %c0_i32_0 : i32, i32
  }
  func.func @transform_7(%arg0: i32, %arg1: i32) -> (i32, i32) {
    %c0_i32 = arith.constant 0 : i32
    %c0_i32_0 = arith.constant 0 : i32
    %c0_i32_1 = arith.constant 0 : i32
    return %c0_i32, %c0_i32_0 : i32, i32
  }
  func.func @transform_8(%arg0: i32, %arg1: i32) -> (i32, i32, i32) {
    %c0_i32 = arith.constant 0 : i32
    %c0_i32_0 = arith.constant 0 : i32
    return %arg0, %arg1, %c0_i32 : i32, i32, i32
  }
  func.func @transform_9(%arg0: i32, %arg1: i32) -> (i32, i32, i32) {
    %c0_i32 = arith.constant 0 : i32
    %c0_i32_0 = arith.constant 0 : i32
    return %arg0, %arg1, %c0_i32 : i32, i32, i32
  }
}

</mosaic_0001>

<bundles_post_ra>
// kernel: tpu_custom_call.1
= control target key start
LH: loop header
LB: loop body
LE: loop exit
PB: predicated region body
PF: predicated region fallthrough
CT: control target
= control target key end

     0   :  { %s1388_s30 = smov 0   ;;  %s1390_s10 = smov 0   ;;  %s1625_s0 = inlined_call_operand.vmem [shape: f32[2,128,4], index: 0, kind: input, shape index: {}]   ;;  %s1626_s1 = inlined_call_operand.vmem [shape: f32[2,128,4], index: 1, kind: input, shape index: {}]   ;;  %s1627_s2 = inlined_call_operand.vmem [shape: f32[4,8], index: 2, kind: input, shape index: {}]   ;;  %s1628_s3 = inlined_call_operand.vmem [shape: f32[4,8], index: 3, kind: input, shape index: {}]   ;;  %s1629_s4 = inlined_call_operand.vmem [shape: f32[1,8], index: 4, kind: input, shape index: {}]   ;;  %s1630_s5 = inlined_call_operand.vmem [shape: f32[3,8], index: 5, kind: input, shape index: {}]   ;;  %s1631_s6 = inlined_call_operand.vmem [shape: f32[1,8], index: 6, kind: input, shape index: {}]   ;;  %s1632_s7 = inlined_call_operand.vmem [shape: f32[8,4], index: 7, kind: input, shape index: {}]   ;;  %s1633_s8 = inlined_call_operand.vmem [shape: f32[2,128,4], index: 8, kind: output, shape index: {0}]   ;;  %s1634_s9 = inlined_call_operand.vmem [shape: f32[2,128,8], index: 9, kind: output, shape index: {1}]  }
   0x1   :  { %s1392_s11 = smov 0   ;;  %s1394_s12 = smov 0  }
   0x2   :  { %s1396_s13 = smov 0  }
   0x3 LB: > { %s29_s14 = sadd.s32 1, %s1327_s11  ;;  %s32_s15 = sadd.s32 1, %s1331_s12  ;;  %s1335_s13 = sphi %s1396_s13, %s20_s13   ;;  %s1331_s12 = sphi %s1394_s12, %s1640_s12   ;;  %s1327_s11 = sphi %s1392_s11, %s1639_s11   ;;  %s1323_s10 = sphi %s1390_s10, %s1638_s10   ;;  %s1319_s30 = sphi %s1388_s30, %s1637_s30  }
   0x4   : > { %p30_p0 = scmp.ge.s32.totalorder %s29_s14, 2  ;;  %p1141_p1 = scmp.ge.s32.totalorder %s1335_s13, 1 }
   0x5   : > { %p330_p2 = scmp.lt.s32.totalorder %s1335_s13, 5 }
   0x6   : > { %s1642_s14 = smov (%p30_p0, %s29_s14), 0  ;;  %s1644_s15 = smov (!%p30_p0, %s32_s15), %s1331_s12 }
   0x7   : > { %p331_p3 = pnand %p1141_p1, %p330_p2  ;;  %p34_p4 = scmp.ge.s32.totalorder %s1644_s15, 2 }
   0x8   : > { %s1142_s16 = sshll.u32 (!%p331_p3), %s1319_s30, 3  ;;  %p393_p5 = scmp.lt.s32.totalorder (!%p331_p3), %s1323_s10, 1 }
   0x9   : > { %s1646_s15 = smov (%p34_p4, %s1644_s15), 0  ;;  %334 = sbr.rel (%p331_p3) target bundleno = 457 (0x1c9), region = 52 }
   0xa   : > { %1635 = sst [smem:[#allocation3_spill]] %s1646_s15  ;;  %p395_p6 = scmp.lt.s32.totalorder (!%p331_p3), %s1142_s16, 15 }
   0xb   : > { %p1154_p7 = scmp.ne.s32.totalorder (!%p331_p3), %s1319_s30, 0 }
   0xe   : > { %s1648_s10 = smov (!%p393_p5, %s1323_s10), 1  ;;  %s1650_s16 = smov (!%p395_p6, %s1142_s16), 15 }
   0xf   : > { %s1143_s17 = sshll.u32 %s1648_s10, 4  ;;  %435 = sbr.rel (%p1154_p7) target bundleno = 23 (0x17), region = 56 }
  0x10   : > { %s398_s18 = sadd.s32 %s1143_s17, %s1650_s16 }
  0x11   : > { %s1144_s19 = sshll.u32 %s398_s18, 3 }
  0x12   : > { %s1421_s22 = scalar_lea.vmem %s1625_s0, %s1144_s19  ;;  %s1426_s25 = scalar_lea.vmem %s1626_s1, %s1144_s19 }
  0x13   : > { %s1431_s28 = scalar_lea.vmem %s1633_s8, %s1144_s19  ;;  %s1436_s10 = scalar_lea.vmem %s1634_s9, %s1144_s19 }
  0x14   : > { %vm436_vm0 = vcmask 64512   ;;  %v1337_v0 = vmov 0.0  }
  0x15   : > { %437 = vst.msk [vmem:[#allocation2] sm:$0xff] %vm436_vm0, %v1337_v0  ;;  %438 = vst.msk [vmem:[#allocation2 + $0x8] sm:$0xff] %vm436_vm0, %v1337_v0 }
  0x16   : > { %439 = vst.msk [vmem:[#allocation2 + $0x10] sm:$0xff] %vm436_vm0, %v1337_v0  ;;  %440 = vst.msk [vmem:[#allocation2 + $0x18] sm:$0xff] %vm436_vm0, %v1337_v0 }
  0x17 PF: > { %v458_v1 = vld [vmem:[%s1628_s3] sm:$0xf]  ;;  %vm484_vm1 = vcmask 1043456   ;;  %vm459_vm2 = vcmask 31744   ;;  %v454_v3 = vld [vmem:[%s1426_s25 + $0x28] sm:$0xff]  ;;  %v455_v5 = vld [vmem:[%s1426_s25 + $0x30] sm:$0xff]  ;;  %v758_v16 = vlaneseq }
  0x18   : > { %v453_v2 = vld [vmem:[%s1426_s25 + $0x20] sm:$0xff]  ;;  %1254 = vmatprep.subr.msk.mxu1 %vm484_vm1, %v458_v1  ;;  %1212 = vmatprep.subr.msk.mxu0 %vm484_vm1, %v458_v1  ;;  %v450_v7 = vld [vmem:[%s1426_s25 + $0x8] sm:$0xff]  ;;  %v456_v8 = vld [vmem:[%s1426_s25 + $0x38] sm:$0xff]  ;;  %vm748_vm3 = vcmask 64512  }
  0x19   : > { %1220 = vmatprep.mubr.msk.f32.mxu1 %vm459_vm2, %v453_v2  ;;  %v457_v4 = vld [vmem:[%s1627_s2] sm:$0xf]  ;;  %1255 = vmatpush3.msk.msra.mxu1 %vm484_vm1, %v458_v1  ;;  %v451_v9 = vld [vmem:[%s1426_s25 + $0x10] sm:$0xff]  ;;  %v452_v10 = vld [vmem:[%s1426_s25 + $0x18] sm:$0xff]  ;;  %v759_v18 = vshrl.u32 %v758_v16, 7 }
  0x1a   : > { %v449_v6 = vld [vmem:[%s1426_s25] sm:$0xff]  ;;  %1221 = vmatmul.mubr.msk.f32.vlgmr.msra.gmra.mxu1 %vm459_vm2, %v454_v3  ;;  %1226 = vmatprep.subr.msk.mxu1 %vm484_vm1, %v457_v4  ;;  %v1466_v11 = vld [vmem:[%s1421_s22 + $0x8] sm:$0xff]  ;;  %v1472_v12 = vld [vmem:[%s1421_s22 + $0x18] sm:$0xff] }
  0x1b   : > { %1227 = vmatpush3.msk.msra.mxu1 %vm484_vm1, %v457_v4  ;;  %1223 = vmatprep.mubr.msk.f32.mxu1 %vm459_vm2, %v455_v5  ;;  %v1477_v13 = vld [vmem:[%s1421_s22 + $0x28] sm:$0xff]  ;;  %v1482_v14 = vld [vmem:[%s1421_s22 + $0x38] sm:$0xff]  ;;  %v841_v15 = vld [vmem:[%s1632_s7] sm:$0xff]  ;;  %v776_v22 = vsub.s32 0, %v759_v18  ;;  %v760_v25 = vsub.s32 2, %v759_v18  ;;  %v796_v29 = vsub.s32 1, %v759_v18 }
  0x1c   : > { %1213 = vmatpush3.msk.msra.mxu0 %vm484_vm1, %v458_v1  ;;  %1214 = vmatprep.mubr.msk.f32.mxu0 %vm459_vm2, %v449_v6  ;;  %v757_v24 = vld [vmem:[%s1630_s5] sm:$0x7]  ;;  %v771_v32 = vld [vmem:[#allocation2 + $0x8] sm:$0xff] }
  0x1d   : > { %1215 = vmatmul.mubr.msk.f32.vlgmr.msra.gmra.mxu0 %vm459_vm2, %v450_v7  ;;  %1240 = vmatprep.subr.mxu0 %v841_v15  ;;  %v1499_v28 = vld [vmem:[%s1629_s4] ss:$0 sm:$0xff]  ;;  %v1501_v31 = vrot.slane %v757_v24, %v776_v22  ;;  %v1504_v35 = vrot.slane %v757_v24, %v760_v25  ;;  %v1506_v38 = vrot.slane %v757_v24, %v796_v29  ;;  %v773_v41 = vld [vmem:[#allocation2 + $0x18] sm:$0xff]  ;;  %v772_v46 = vld [vmem:[#allocation2 + $0x10] sm:$0xff] }
  0x1e   : > { %1224 = vmatmul.mubr.msk.f32.gmra.mxu1 %vm459_vm2, %v456_v8  ;;  %1217 = vmatprep.mubr.msk.f32.mxu0 %vm459_vm2, %v451_v9  ;;  %v770_v40 = vld [vmem:[#allocation2] sm:$0xff] }
  0x1f   : > { %1241 = vmatpush3.msra.mxu0 %v841_v15  ;;  %v779_v43 = vmul.f32 %v1501_v31, %v771_v32  ;;  %v799_v51 = vmul.f32 %v1506_v38, %v773_v41  ;;  %v778_v52 = vmul.f32 %v1501_v31, %v770_v40  ;;  %v781_v56 = vmul.f32 %v1501_v31, %v773_v41  ;;  %v1529_v6 = vld [vmem:[%s1631_s6] ss:$0 sm:$0xff] }
  0x20   : > { %v798_v57 = vmul.f32 %v1506_v38, %v772_v46  ;;  %v780_v61 = vmul.f32 %v1501_v31, %v772_v46 }
  0x21   : > { %1218 = vmatmul.mubr.msk.f32.gmra.mxu0 %vm459_vm2, %v452_v10 }
  0x22   : > { %1229 = vmatmul.mubr.msk.f32.vlgmr.msra.gmra.mxu1 %vm459_vm2, %v1466_v11 }
  0x26   : > { %1232 = vmatmul.mubr.msk.f32.gmra.mxu1 %vm459_vm2, %v1472_v12 }
  0x2a   : > { %1235 = vmatmul.mubr.msk.f32.gmra.mxu1 %vm459_vm2, %v1477_v13 }
  0x2e   : > { %1238 = vmatmul.mubr.msk.f32.gmra.mxu1 %vm459_vm2, %v1482_v14 }
  0xda   : > { %v1222_v17 = vpop.f32.mrf.mxu1 }
  0xdc   : > { %v574_v19 = vpop.f32.mrf.mxu1 }
  0xdd   : > { %v1216_v20 = vpop.f32.mrf.mxu0 }
  0xde   : > { %v1489_v21 = vpop.f32.mrf.mxu1 }
  0xdf   : > { %v554_v26 = vpop.f32.mrf.mxu0 }
  0xe0   : > { %v1491_v23 = vpop.f32.mrf.mxu1 }
  0xe1   : > { %v1219_v37 = vpop.f32.mrf.mxu0 }
  0xe2   : > { %v1230_v27 = vpop.f32.mrf.mxu1 }
  0xe3   : > { %v692_v30 = vadd.f32 %v1230_v27, %v1216_v20  ;;  %v564_v50 = vpop.f32.mrf.mxu0 }
  0xe4   : > { %v686_v33 = vpop.f32.mrf.mxu1 }
  0xe5   : > { %v733_v34 = vadd.f32 %v1499_v28, %v692_v30  ;;  %v687_v36 = vadd.f32 %v686_v33, %v554_v26 }
  0xe6   : > { %v1233_v39 = vpop.f32.mrf.mxu1 }
  0xe7   : > { %v741_v42 = vmax.f32 %v733_v34, 0.0  ;;  %v732_v44 = vadd.f32 %v1499_v28, %v687_v36  ;;  %v702_v45 = vadd.f32 %v1233_v39, %v1219_v37 }
  0xe8   : > { %v696_v47 = vpop.f32.mrf.mxu1 }
  0xe9   : > { %750 = vst.msk [vmem:[%s1436_s10 + $0x8] sm:$0xff] %vm748_vm3, %v741_v42  ;;  %v763_v48 = vmul.f32 %v1504_v35, %v741_v42  ;;  %v740_v49 = vmax.f32 %v732_v44, 0.0  ;;  %v735_v53 = vadd.f32 %v1499_v28, %v702_v45  ;;  %v697_v54 = vadd.f32 %v696_v47, %v564_v50  ;;  %v441_v47 = vld [vmem:[%s1421_s22] sm:$0xff] }
  0xea   : > { %v1236_v55 = vpop.f32.mrf.mxu1  ;;  %v783_v62 = vmul.f32 %v1501_v31, %v741_v42  ;;  %v801_v63 = vmul.f32 %v1506_v38, %v741_v42 }
  0xeb   : > { %v787_v58 = vadd.f32 %v779_v43, %v763_v48  ;;  %749 = vst.msk [vmem:[%s1436_s10] sm:$0xff] %vm748_vm3, %v740_v49  ;;  %v762_v59 = vmul.f32 %v1504_v35, %v740_v49  ;;  %v712_v60 = vadd.f32 %v1236_v55, %v1222_v17  ;;  %v743_v0 = vmax.f32 %v735_v53, 0.0 }
  0xec   : > { %v734_v1 = vadd.f32 %v1499_v28, %v697_v54  ;;  %v706_v2 = vpop.f32.mrf.mxu1  ;;  %v800_v15 = vmul.f32 %v1506_v38, %v740_v49  ;;  %v782_v16 = vmul.f32 %v1501_v31, %v740_v49 }
  0xed   : > { %v737_v3 = vadd.f32 %v1499_v28, %v712_v60  ;;  %v707_v4 = vadd.f32 %v706_v2, %v574_v19  ;;  %v807_v5 = vadd.f32 %v799_v51, %v787_v58  ;;  %v786_v7 = vadd.f32 %v778_v52, %v762_v59  ;;  %752 = vst.msk [vmem:[%s1436_s10 + $0x18] sm:$0xff] %vm748_vm3, %v743_v0  ;;  %v443_v59 = vld [vmem:[%s1421_s22 + $0x10] sm:$0xff]  ;;  %v445_v2 = vld [vmem:[%s1421_s22 + $0x20] sm:$0xff] }
  0xee   : > { %v765_v8 = vmul.f32 %v1504_v35, %v743_v0  ;;  %v742_v9 = vmax.f32 %v734_v1, 0.0  ;;  %v1239_v10 = vpop.f32.mrf.mxu1  ;;  %v785_v17 = vmul.f32 %v1501_v31, %v743_v0  ;;  %v803_v29 = vmul.f32 %v1506_v38, %v743_v0 }
  0xef   : > { %v745_v18 = vmax.f32 %v737_v3, 0.0  ;;  %v736_v19 = vadd.f32 %v1499_v28, %v707_v4  ;;  %v722_v20 = vadd.f32 %v1239_v10, %v1489_v21  ;;  %v826_v22 = vadd.f32 %v1529_v6, %v807_v5 }
  0xf0   : > { %751 = vst.msk [vmem:[%s1436_s10 + $0x10] sm:$0xff] %vm748_vm3, %v742_v9  ;;  %v716_v24 = vpop.f32.mrf.mxu1  ;;  %v806_v25 = vadd.f32 %v798_v57, %v786_v7  ;;  %v764_v26 = vmul.f32 %v1504_v35, %v742_v9  ;;  %v789_v27 = vadd.f32 %v781_v56, %v765_v8  ;;  %v802_v37 = vmul.f32 %v1506_v38, %v742_v9  ;;  %v447_v7 = vld [vmem:[%s1421_s22 + $0x30] sm:$0xff] }
  0xf1   : > { %754 = vst.msk [vmem:[%s1436_s10 + $0x28] sm:$0xff] %vm748_vm3, %v745_v18  ;;  %v767_v30 = vmul.f32 %v1504_v35, %v745_v18  ;;  %815 = vst.msk [vmem:[#allocation2 + $0x8] sm:$0xff] %vm748_vm3, %v745_v18  ;;  %v744_v32 = vmax.f32 %v736_v19, 0.0  ;;  %v739_v21 = vadd.f32 %v1499_v28, %v722_v20  ;;  %v717_v33 = vadd.f32 %v716_v24, %v1491_v23 }
  0xf2   : > { %v825_v34 = vadd.f32 %v1529_v6, %v806_v25  ;;  %v788_v36 = vadd.f32 %v780_v61, %v764_v26  ;;  %v809_v40 = vadd.f32 %v801_v63, %v789_v27  ;;  %v834_v43 = vmax.f32 %v826_v22, 0.0 }
  0xf3   : > { %753 = vst.msk [vmem:[%s1436_s10 + $0x20] sm:$0xff] %vm748_vm3, %v744_v32  ;;  %814 = vst.msk [vmem:[#allocation2] sm:$0xff] %vm748_vm3, %v744_v32  ;;  %v747_v39 = vmax.f32 %v739_v21, 0.0  ;;  %v766_v41 = vmul.f32 %v1504_v35, %v744_v32  ;;  %v791_v42 = vadd.f32 %v783_v62, %v767_v30  ;;  %v738_v44 = vadd.f32 %v1499_v28, %v717_v33 }
  0xf4   : > { %v833_v45 = vmax.f32 %v825_v34, 0.0  ;;  %v808_v23 = vadd.f32 %v800_v15, %v788_v36  ;;  %v828_v48 = vadd.f32 %v1529_v6, %v809_v40  ;;  %v805_v52 = vmul.f32 %v1506_v38, %v745_v18 }
  0xf5   : > { %756 = vst.msk [vmem:[%s1436_s10 + $0x38] sm:$0xff] %vm748_vm3, %v747_v39  ;;  %v769_v46 = vmul.f32 %v1504_v35, %v747_v39  ;;  %817 = vst.msk [vmem:[#allocation2 + $0x18] sm:$0xff] %vm748_vm3, %v747_v39  ;;  %v790_v49 = vadd.f32 %v782_v16, %v766_v41  ;;  %v811_v50 = vadd.f32 %v803_v29, %v791_v42  ;;  %v746_v51 = vmax.f32 %v738_v44, 0.0 }
  0xf6   : > { %1242 = vmatprep.mubr.msk.f32.mxu0 %vm748_vm3, %v833_v45  ;;  %v827_v28 = vadd.f32 %v1529_v6, %v808_v23  ;;  %v784_v57 = vmul.f32 %v1501_v31, %v742_v9  ;;  %v836_v58 = vmax.f32 %v828_v48, 0.0 }
  0xf7   : > { %v793_v53 = vadd.f32 %v785_v17, %v769_v46  ;;  %1243 = vmatmul.mubr.msk.f32.vlgmr.msra.gmra.mxu0 %vm748_vm3, %v834_v43  ;;  %v810_v54 = vadd.f32 %v802_v37, %v790_v49  ;;  %755 = vst.msk [vmem:[%s1436_s10 + $0x30] sm:$0xff] %vm748_vm3, %v746_v51  ;;  %v768_v55 = vmul.f32 %v1504_v35, %v746_v51  ;;  %816 = vst.msk [vmem:[#allocation2 + $0x10] sm:$0xff] %vm748_vm3, %v746_v51 }
  0xf8   : > { %1228 = vmatprep.mubr.msk.f32.mxu0 %vm459_vm2, %v441_v47  ;;  %v835_v56 = vmax.f32 %v827_v28, 0.0  ;;  %v830_v61 = vadd.f32 %v1529_v6, %v811_v50  ;;  %v804_v35 = vmul.f32 %v1506_v38, %v744_v32 }
  0xf9   : > { %v829_v60 = vadd.f32 %v1529_v6, %v810_v54  ;;  %v813_v62 = vadd.f32 %v805_v52, %v793_v53  ;;  %v792_v63 = vadd.f32 %v784_v57, %v768_v55 }
  0xfa   : > { %1245 = vmatprep.mubr.msk.f32.mxu0 %vm748_vm3, %v835_v56  ;;  %v838_v31 = vmax.f32 %v830_v61, 0.0 }
  0xfb   : > { %1246 = vmatmul.mubr.msk.f32.gmra.mxu0 %vm748_vm3, %v836_v58  ;;  %v837_v0 = vmax.f32 %v829_v60, 0.0  ;;  %v812_v1 = vadd.f32 %v804_v35, %v792_v63  ;;  %v832_v3 = vadd.f32 %v1529_v6, %v813_v62 }
  0xfc   : > { %1231 = vmatprep.mubr.msk.f32.mxu0 %vm459_vm2, %v443_v59 }
  0xfd   : > { %1248 = vmatprep.mubr.msk.f32.mxu0 %vm748_vm3, %v837_v0  ;;  %v831_v4 = vadd.f32 %v1529_v6, %v812_v1  ;;  %v840_v5 = vmax.f32 %v832_v3, 0.0 }
  0xff   : > { %1249 = vmatmul.mubr.msk.f32.gmra.mxu0 %vm748_vm3, %v838_v31  ;;  %v839_v38 = vmax.f32 %v831_v4, 0.0 }
 0x100   : > { %1234 = vmatprep.mubr.msk.f32.mxu0 %vm459_vm2, %v445_v2 }
 0x101   : > { %1251 = vmatprep.mubr.msk.f32.mxu0 %vm748_vm3, %v839_v38 }
 0x103   : > { %1252 = vmatmul.mubr.msk.f32.gmra.mxu0 %vm748_vm3, %v840_v5 }
 0x104   : > { %1237 = vmatprep.mubr.msk.f32.mxu0 %vm459_vm2, %v447_v7 }
 0x1b7   : > { %v1244_v8 = vpop.f32.mrf.mxu0 }
 0x1b8   : > { %v938_v9 = vadd.f32 %v1244_v8, %v1466_v11 }
 0x1b9   : > { %v932_v6 = vpop.f32.mrf.mxu0 }
 0x1ba   : > { %972 = vst.msk [vmem:[%s1431_s28 + $0x8] sm:$0xff] %vm459_vm2, %v938_v9  ;;  %v933_v10 = vadd.f32 %v932_v6, %v441_v47 }
 0x1bb   : > { %v1247_v15 = vpop.f32.mrf.mxu0 }
 0x1bc   : > { %971 = vst.msk [vmem:[%s1431_s28] sm:$0xff] %vm459_vm2, %v933_v10  ;;  %v948_v16 = vadd.f32 %v1247_v15, %v1472_v12 }
 0x1bd   : > { %v942_v17 = vpop.f32.mrf.mxu0 }
 0x1be   : > { %974 = vst.msk [vmem:[%s1431_s28 + $0x18] sm:$0xff] %vm459_vm2, %v948_v16  ;;  %v943_v18 = vadd.f32 %v942_v17, %v443_v59 }
 0x1bf   : > { %v1250_v19 = vpop.f32.mrf.mxu0 }
 0x1c0   : > { %973 = vst.msk [vmem:[%s1431_s28 + $0x10] sm:$0xff] %vm459_vm2, %v943_v18  ;;  %v958_v11 = vadd.f32 %v1250_v19, %v1477_v13 }
 0x1c1   : > { %v952_v20 = vpop.f32.mrf.mxu0 }
 0x1c2   : > { %976 = vst.msk [vmem:[%s1431_s28 + $0x28] sm:$0xff] %vm459_vm2, %v958_v11  ;;  %v953_v22 = vadd.f32 %v952_v20, %v445_v2 }
 0x1c3   : > { %v1253_v24 = vpop.f32.mrf.mxu0 }
 0x1c4   : > { %975 = vst.msk [vmem:[%s1431_s28 + $0x20] sm:$0xff] %vm459_vm2, %v953_v22  ;;  %v968_v25 = vadd.f32 %v1253_v24, %v1482_v14 }
 0x1c5   : > { %v962_v12 = vpop.f32.mrf.mxu0 }
 0x1c6   : > { %978 = vst.msk [vmem:[%s1431_s28 + $0x38] sm:$0xff] %vm459_vm2, %v968_v25  ;;  %v963_v26 = vadd.f32 %v962_v12, %v447_v7 }
 0x1c8   : > { %977 = vst.msk [vmem:[%s1431_s28 + $0x30] sm:$0xff] %vm459_vm2, %v963_v26 }
 0x1c9 PF: > { %s20_s13 = sadd.s32 1, %s1335_s13   ;;  %s1636_s22 = sld [smem:[#allocation3_spill]] }
 0x1ca   : > { %p17_p8 = scmp.ge.s32.totalorder %s20_s13, 6   ;;  %s1637_s30 = smov %s1327_s11 }
 0x1cb   : > { %s1638_s10 = smov %s1331_s12  ;;  %s1639_s11 = smov %s1642_s14 }
 0x1cc   :  { %19 = sbr.rel (!%p17_p8) target bundleno = 3 (0x3), region = 101 }
 0x1cf   : > { %s1640_s12 = smov %s1636_s22 }

</bundles_post_ra>
